<compile_context>
chip_gen: v7x
topology: tpu7x:2x2x1
jax: 0.10.0
libtpu: 0.0.40
codegen_flags: <defaults>
</compile_context>

<pallas_src>
import math
import functools

import jax
import jax.numpy as jnp
from jax.experimental import pallas as pl
from jax.experimental.pallas import tpu as pltpu


# ----------------------------------------------------------------------------
# Tiling helper
# ----------------------------------------------------------------------------
def _pick_tile(dim, target, step=128):
    """Largest multiple of `step` <= target that divides dim, else full dim.

    Returned tile is either `step`-aligned (sublane/lane aligned) or the full
    extent, so BlockSpec layout constraints are always satisfied.
    """
    if dim <= target:
        return dim
    t = (target // step) * step
    while t >= step:
        if dim % t == 0:
            return t
        t -= step
    return dim


# ----------------------------------------------------------------------------
# Fused Q/K/V projection: one pallas_call, three matmuls per grid step
# ----------------------------------------------------------------------------
def _qkv_proj_kernel(xq_ref, xk_ref, xv_ref, w_ref, b_ref,
                     oq_ref, ok_ref, ov_ref,
                     accq_ref, acck_ref, accv_ref):
    kk = pl.program_id(2)

    @pl.when(kk == 0)
    def _():
        accq_ref[...] = jnp.zeros_like(accq_ref)
        acck_ref[...] = jnp.zeros_like(acck_ref)
        accv_ref[...] = jnp.zeros_like(accv_ref)

    accq_ref[...] += jnp.dot(xq_ref[...], w_ref[0],
                             preferred_element_type=jnp.float32)
    acck_ref[...] += jnp.dot(xk_ref[...], w_ref[1],
                             preferred_element_type=jnp.float32)
    accv_ref[...] += jnp.dot(xv_ref[...], w_ref[2],
                             preferred_element_type=jnp.float32)

    @pl.when(kk == pl.num_programs(2) - 1)
    def _():
        oq_ref[...] = (accq_ref[...] + b_ref[0]).astype(oq_ref.dtype)
        ok_ref[...] = (acck_ref[...] + b_ref[1]).astype(ok_ref.dtype)
        ov_ref[...] = (accv_ref[...] + b_ref[2]).astype(ov_ref.dtype)


def qkv_projection(xq, xk, xv, w_qkv, b_qkv, *, tm=256, tn=512, tk=512):
    """xq/xk/xv: (M, K); w_qkv: (3, K, N); b_qkv: (3, N) -> 3 x (M, N) f32."""
    M, K = xq.shape
    _, K2, N = w_qkv.shape
    assert K == K2
    tm = _pick_tile(M, tm, step=8)     # sublane axis of x / out blocks
    tn = _pick_tile(N, tn, step=128)   # lane axis of out / w blocks
    tk = _pick_tile(K, tk, step=128)   # lane axis of x, sublane axis of w
    grid = (M // tm, N // tn, K // tk)
    cost = pl.CostEstimate(
        flops=3 * 2 * M * N * K,
        transcendentals=0,
        bytes_accessed=4 * 3 * (M * K + K * N + M * N + N),
    )
    out_sds = jax.ShapeDtypeStruct((M, N), jnp.float32)
    return pl.pallas_call(
        _qkv_proj_kernel,
        out_shape=(out_sds, out_sds, out_sds),
        grid_spec=pltpu.PrefetchScalarGridSpec(
            num_scalar_prefetch=0,
            grid=grid,
            in_specs=[
                pl.BlockSpec((tm, tk), lambda i, j, kk: (i, kk)),     # xq
                pl.BlockSpec((tm, tk), lambda i, j, kk: (i, kk)),     # xk
                pl.BlockSpec((tm, tk), lambda i, j, kk: (i, kk)),     # xv
                pl.BlockSpec((3, tk, tn), lambda i, j, kk: (0, kk, j)),  # w
                pl.BlockSpec((3, 1, tn), lambda i, j, kk: (0, 0, j)),    # b
            ],
            out_specs=[
                pl.BlockSpec((tm, tn), lambda i, j, kk: (i, j)),
                pl.BlockSpec((tm, tn), lambda i, j, kk: (i, j)),
                pl.BlockSpec((tm, tn), lambda i, j, kk: (i, j)),
            ],
            scratch_shapes=[pltpu.VMEM((tm, tn), jnp.float32)] * 3,
        ),
        compiler_params=pltpu.CompilerParams(
            dimension_semantics=("parallel", "parallel", "arbitrary"),
            vmem_limit_bytes=32 * 1024 * 1024,
        ),
        cost_estimate=cost,
    )(xq, xk, xv, w_qkv, b_qkv.reshape(3, 1, N))


# ----------------------------------------------------------------------------
# Tiled matmul + bias kernel (output projection)
# ----------------------------------------------------------------------------
def _matmul_bias_kernel(x_ref, w_ref, b_ref, o_ref, acc_ref):
    kk = pl.program_id(2)

    @pl.when(kk == 0)
    def _():
        acc_ref[...] = jnp.zeros_like(acc_ref)

    acc_ref[...] += jnp.dot(x_ref[...], w_ref[...],
                            preferred_element_type=jnp.float32)

    @pl.when(kk == pl.num_programs(2) - 1)
    def _():
        o_ref[...] = (acc_ref[...] + b_ref[...]).astype(o_ref.dtype)


def linear(x2d, w, b, *, tm=256, tn=512, tk=512):
    """x2d: (M, K) f32; w: (K, N); b: (N,) -> (M, N) f32. Tiled + pipelined."""
    M, K = x2d.shape
    K2, N = w.shape
    assert K == K2
    tm = _pick_tile(M, tm, step=8)
    tn = _pick_tile(N, tn, step=128)
    tk = _pick_tile(K, tk, step=128)
    grid = (M // tm, N // tn, K // tk)
    cost = pl.CostEstimate(
        flops=2 * M * N * K,
        transcendentals=0,
        bytes_accessed=4 * (M * K + K * N + M * N + N),
    )
    return pl.pallas_call(
        _matmul_bias_kernel,
        out_shape=jax.ShapeDtypeStruct((M, N), jnp.float32),
        grid_spec=pltpu.PrefetchScalarGridSpec(
            num_scalar_prefetch=0,
            grid=grid,
            in_specs=[
                pl.BlockSpec((tm, tk), lambda i, j, kk: (i, kk)),
                pl.BlockSpec((tk, tn), lambda i, j, kk: (kk, j)),
                pl.BlockSpec((1, tn), lambda i, j, kk: (0, j)),
            ],
            out_specs=pl.BlockSpec((tm, tn), lambda i, j, kk: (i, j)),
            scratch_shapes=[pltpu.VMEM((tm, tn), jnp.float32)],
        ),
        compiler_params=pltpu.CompilerParams(
            dimension_semantics=("parallel", "parallel", "arbitrary"),
            vmem_limit_bytes=32 * 1024 * 1024,
        ),
        cost_estimate=cost,
    )(x2d, w, b.reshape(1, N))


# ----------------------------------------------------------------------------
# Flash-style scaled dot product attention
# ----------------------------------------------------------------------------
def _flash_sdpa_kernel(q_ref, k_ref, v_ref, o_ref, m_ref, l_ref, acc_ref, *, scale):
    kv = pl.program_id(3)

    @pl.when(kv == 0)
    def _():
        m_ref[...] = jnp.full_like(m_ref, -jnp.inf)
        l_ref[...] = jnp.zeros_like(l_ref)
        acc_ref[...] = jnp.zeros_like(acc_ref)

    # Fold the softmax scale into the small (tq, D) q tile instead of the
    # (tq, tkv) score tile; contract K on its native layout (no XLU transpose).
    q = q_ref[...] * scale
    s = jax.lax.dot_general(
        q, k_ref[...],
        dimension_numbers=(((1,), (1,)), ((), ())),
        preferred_element_type=jnp.float32,
    )  # (tq, tkv)

    m_prev = m_ref[...]
    m_new = jnp.maximum(m_prev, jnp.max(s, axis=-1, keepdims=True))
    alpha = jnp.exp(m_prev - m_new)
    p = jnp.exp(s - m_new)
    l_ref[...] = alpha * l_ref[...] + jnp.sum(p, axis=-1, keepdims=True)
    acc_ref[...] = alpha * acc_ref[...] + jnp.dot(
        p.astype(v_ref.dtype), v_ref[...], preferred_element_type=jnp.float32)
    m_ref[...] = m_new

    @pl.when(kv == pl.num_programs(3) - 1)
    def _():
        o_ref[...] = (acc_ref[...] *
                      pl.reciprocal(l_ref[...], approx=True)).astype(o_ref.dtype)
    # TODO(synk): mask=None path only; additive/boolean attention mask not wired in.


def flash_attention(q, k, v, *, tq=256, tkv=512):
    """q, k, v: (B, H, S, D) f32 -> (B, H, S, D). KV-tiled online softmax."""
    B, H, S, D = q.shape
    tq = _pick_tile(S, tq, step=8)
    tkv = _pick_tile(S, tkv, step=8)
    scale = 1.0 / math.sqrt(D)
    grid = (B, H, S // tq, S // tkv)

    q_spec = pl.BlockSpec((pl.Squeezed(), pl.Squeezed(), tq, D),
                          lambda b, h, qi, ki: (b, h, qi, 0))
    kv_spec = pl.BlockSpec((pl.Squeezed(), pl.Squeezed(), tkv, D),
                           lambda b, h, qi, ki: (b, h, ki, 0))
    cost = pl.CostEstimate(
        flops=4 * B * H * S * S * D,          # QK^T + PV
        transcendentals=B * H * S * S,        # exp
        bytes_accessed=4 * 4 * B * H * S * D,
    )
    return pl.pallas_call(
        functools.partial(_flash_sdpa_kernel, scale=scale),
        out_shape=jax.ShapeDtypeStruct((B, H, S, D), jnp.float32),
        grid_spec=pltpu.PrefetchScalarGridSpec(
            num_scalar_prefetch=0,
            grid=grid,
            in_specs=[q_spec, kv_spec, kv_spec],
            out_specs=q_spec,
            scratch_shapes=[
                pltpu.VMEM((tq, 1), jnp.float32),   # running max
                pltpu.VMEM((tq, 1), jnp.float32),   # running denom
                pltpu.VMEM((tq, D), jnp.float32),   # running accumulator
            ],
        ),
        compiler_params=pltpu.CompilerParams(
            dimension_semantics=("parallel", "parallel", "parallel", "arbitrary"),
            vmem_limit_bytes=32 * 1024 * 1024,
        ),
        cost_estimate=cost,
    )(q, k, v)


# ----------------------------------------------------------------------------
# MultiHeadAttention module (parameters + forward glue)
# ----------------------------------------------------------------------------
def init_mha_params(key, embedding_dim):
    """PyTorch-nn.Linear-style init: U(-1/sqrt(in), 1/sqrt(in)). QKV stacked."""
    bound = 1.0 / math.sqrt(embedding_dim)
    keys = jax.random.split(key, 8)

    def u(k, shape):
        return jax.random.uniform(k, shape, minval=-bound, maxval=bound,
                                  dtype=jnp.float32)

    w_q = u(keys[0], (embedding_dim, embedding_dim))
    w_k = u(keys[1], (embedding_dim, embedding_dim))
    w_v = u(keys[2], (embedding_dim, embedding_dim))
    b_q = u(keys[3], (embedding_dim,))
    b_k = u(keys[4], (embedding_dim,))
    b_v = u(keys[5], (embedding_dim,))
    return {
        "w_qkv": jnp.stack([w_q, w_k, w_v]),   # (3, E, E)
        "b_qkv": jnp.stack([b_q, b_k, b_v]),   # (3, E)
        "w_out": u(keys[6], (embedding_dim, embedding_dim)),
        "b_out": u(keys[7], (embedding_dim,)),
    }


def multi_head_attention(params, q, k, v, n_head):
    """q, k, v: (B, S, E) f32 -> (B, S, E)."""
    B, S, E = q.shape
    D = E // n_head
    M = B * S

    # Fused QKV projection (single tiled pallas_call, no activation stacking).
    qp, kp, vp = qkv_projection(q.reshape(M, E), k.reshape(M, E), v.reshape(M, E),
                                params["w_qkv"], params["b_qkv"])

    # Head split (XLA reshape/transpose).
    # TODO(synk): head split/merge still round-trips HBM at the XLA level;
    # folding it into the BlockSpecs needs sub-128 lane blocks (and heads as a
    # K axis would shrink the MXU contraction to D), so it stays outside.
    def split(x):
        return x.reshape(B, S, n_head, D).transpose(0, 2, 1, 3)  # (B, H, S, D)

    out = flash_attention(split(qp), split(kp), split(vp))        # (B, H, S, D)

    # Merge heads + output projection.
    out = out.transpose(0, 2, 1, 3).reshape(M, E)
    out = linear(out, params["w_out"], params["b_out"])
    return out.reshape(B, S, E)


# ----------------------------------------------------------------------------
# Pure-JAX reference
# ----------------------------------------------------------------------------
def _split_heads_ref(x, n_head):
    B, S, E = x.shape
    D = E // n_head
    return x.reshape(B, S, n_head, D).transpose(0, 2, 1, 3)


def reference_mha(params, q, k, v, n_head):
    w_qkv, b_qkv = params["w_qkv"], params["b_qkv"]
    qh = _split_heads_ref(q @ w_qkv[0] + b_qkv[0], n_head)
    kh = _split_heads_ref(k @ w_qkv[1] + b_qkv[1], n_head)
    vh = _split_heads_ref(v @ w_qkv[2] + b_qkv[2], n_head)
    D = qh.shape[-1]
    s = jnp.einsum("bhqd,bhkd->bhqk", qh, kh) / math.sqrt(D)
    p = jax.nn.softmax(s, axis=-1)
    out = jnp.einsum("bhqk,bhkd->bhqd", p, vh)
    B, H, S, D = out.shape
    out = out.transpose(0, 2, 1, 3).reshape(B, S, H * D)
    return out @ params["w_out"] + params["b_out"]


if __name__ == "__main__":
    B, S, E, H = 2, 8, 32, 4

    key = jax.random.PRNGKey(0)
    kp, kq, kk_, kv_ = jax.random.split(key, 4)
    params = init_mha_params(kp, E)
    q = jax.random.normal(kq, (B, S, E), dtype=jnp.float32)
    k = jax.random.normal(kk_, (B, S, E), dtype=jnp.float32)
    v = jax.random.normal(kv_, (B, S, E), dtype=jnp.float32)

    out = jax.block_until_ready(multi_head_attention(params, q, k, v, H))
    ref = reference_mha(params, q, k, v, H)

    assert out.shape == (B, S, E)
    # Tolerance loosened slightly vs. the f32 reference because the final
    # softmax normalization uses the EUP approximate reciprocal.
    assert jnp.allclose(out, ref, atol=1e-2, rtol=1e-2), float(
        jnp.max(jnp.abs(out - ref)))

    print("KERNEL_OK")
</pallas_src>

<mosaic_0001>
module attributes {stable_mosaic.version = 11 : i64} {
  func.func @_qkv_proj_kernel(%arg0: i32, %arg1: i32, %arg2: i32, %arg3: memref<16x32xf32, #tpu.memory_space<vmem>>, %arg4: memref<16x32xf32, #tpu.memory_space<vmem>>, %arg5: memref<16x32xf32, #tpu.memory_space<vmem>>, %arg6: memref<3x32x32xf32, #tpu.memory_space<vmem>>, %arg7: memref<3x1x32xf32, #tpu.memory_space<vmem>>, %arg8: memref<16x32xf32, #tpu.memory_space<vmem>>, %arg9: memref<16x32xf32, #tpu.memory_space<vmem>>, %arg10: memref<16x32xf32, #tpu.memory_space<vmem>>, %arg11: memref<16x32xf32, #tpu.memory_space<vmem>>, %arg12: memref<16x32xf32, #tpu.memory_space<vmem>>, %arg13: memref<16x32xf32, #tpu.memory_space<vmem>>) attributes {dimension_semantics = [#tpu.dimension_semantics<parallel>, #tpu.dimension_semantics<parallel>, #tpu.dimension_semantics<arbitrary>], iteration_bounds = array<i64: 1, 1, 1>, scalar_prefetch = 0 : i64, scratch_operands = 3 : i64, tpu.core_type = #tpu.core_type<tc>, window_params = [{transform_indices = @transform_0, window_bounds = array<i64: 16, 32>}, {transform_indices = @transform_1, window_bounds = array<i64: 16, 32>}, {transform_indices = @transform_2, window_bounds = array<i64: 16, 32>}, {transform_indices = @transform_3, window_bounds = array<i64: 3, 32, 32>}, {transform_indices = @transform_4, window_bounds = array<i64: 3, 1, 32>}, {transform_indices = @transform_5, window_bounds = array<i64: 16, 32>}, {transform_indices = @transform_6, window_bounds = array<i64: 16, 32>}, {transform_indices = @transform_7, window_bounds = array<i64: 16, 32>}]} {
    %c0_i32 = arith.constant 0 : i32
    %0 = arith.cmpi eq, %arg2, %c0_i32 : i32
    %1 = arith.extui %0 : i1 to i32
    %c0_i32_0 = arith.constant 0 : i32
    %2 = arith.cmpi ne, %1, %c0_i32_0 : i32
    scf.if %2 {
      %cst_29 = arith.constant 0.000000e+00 : f32
      %27 = vector.broadcast %cst_29 : f32 to vector<16x32xf32>
      %c0_30 = arith.constant 0 : index
      %c0_31 = arith.constant 0 : index
      %28 = vector.load %arg11[%c0_30, %c0_31] : memref<16x32xf32, #tpu.memory_space<vmem>>, vector<16x32xf32>
      tpu.vector_store %arg11[%c0_30, %c0_31], %27 {strides = array<i32>} : memref<16x32xf32, #tpu.memory_space<vmem>>, vector<16x32xf32>,
      %cst_32 = arith.constant 0.000000e+00 : f32
      %29 = vector.broadcast %cst_32 : f32 to vector<16x32xf32>
      %c0_33 = arith.constant 0 : index
      %c0_34 = arith.constant 0 : index
      %30 = vector.load %arg12[%c0_33, %c0_34] : memref<16x32xf32, #tpu.memory_space<vmem>>, vector<16x32xf32>
      tpu.vector_store %arg12[%c0_33, %c0_34], %29 {strides = array<i32>} : memref<16x32xf32, #tpu.memory_space<vmem>>, vector<16x32xf32>,
      %cst_35 = arith.constant 0.000000e+00 : f32
      %31 = vector.broadcast %cst_35 : f32 to vector<16x32xf32>
      %c0_36 = arith.constant 0 : index
      %c0_37 = arith.constant 0 : index
      %32 = vector.load %arg13[%c0_36, %c0_37] : memref<16x32xf32, #tpu.memory_space<vmem>>, vector<16x32xf32>
      tpu.vector_store %arg13[%c0_36, %c0_37], %31 {strides = array<i32>} : memref<16x32xf32, #tpu.memory_space<vmem>>, vector<16x32xf32>,
    } else {
    }
    %c0 = arith.constant 0 : index
    %c0_1 = arith.constant 0 : index
    %3 = vector.load %arg11[%c0, %c0_1] : memref<16x32xf32, #tpu.memory_space<vmem>>, vector<16x32xf32>
    %c0_2 = arith.constant 0 : index
    %c0_3 = arith.constant 0 : index
    %4 = vector.load %arg3[%c0_2, %c0_3] : memref<16x32xf32, #tpu.memory_space<vmem>>, vector<16x32xf32>
    %c0_4 = arith.constant 0 : index
    %c0_5 = arith.constant 0 : index
    %c0_6 = arith.constant 0 : index
    %5 = vector.load %arg6[%c0_4, %c0_5, %c0_6] : memref<3x32x32xf32, #tpu.memory_space<vmem>>, vector<1x32x32xf32>
    %6 = vector.shape_cast %5 : vector<1x32x32xf32> to vector<32x32xf32>
    %cst = arith.constant dense<0.000000e+00> : vector<16x32xf32>
    %7 = tpu.matmul %4, %6, %cst {dimension_numbers = #tpu.dot_dimension_numbers<[1], [0], [0], [1], [0, 0, 1, 1], [], []>} : vector<16x32xf32>, vector<32x32xf32>, vector<16x32xf32> -> vector<16x32xf32>
    %8 = arith.addf %3, %7 : vector<16x32xf32>
    %c0_7 = arith.constant 0 : index
    %c0_8 = arith.constant 0 : index
    %9 = vector.load %arg11[%c0_7, %c0_8] : memref<16x32xf32, #tpu.memory_space<vmem>>, vector<16x32xf32>
    tpu.vector_store %arg11[%c0_7, %c0_8], %8 {strides = array<i32>} : memref<16x32xf32, #tpu.memory_space<vmem>>, vector<16x32xf32>,
    %c0_9 = arith.constant 0 : index
    %c0_10 = arith.constant 0 : index
    %10 = vector.load %arg12[%c0_9, %c0_10] : memref<16x32xf32, #tpu.memory_space<vmem>>, vector<16x32xf32>
    %c0_11 = arith.constant 0 : index
    %c0_12 = arith.constant 0 : index
    %11 = vector.load %arg4[%c0_11, %c0_12] : memref<16x32xf32, #tpu.memory_space<vmem>>, vector<16x32xf32>
    %c1 = arith.constant 1 : index
    %c0_13 = arith.constant 0 : index
    %c0_14 = arith.constant 0 : index
    %12 = vector.load %arg6[%c1, %c0_13, %c0_14] : memref<3x32x32xf32, #tpu.memory_space<vmem>>, vector<1x32x32xf32>
    %13 = vector.shape_cast %12 : vector<1x32x32xf32> to vector<32x32xf32>
    %cst_15 = arith.constant dense<0.000000e+00> : vector<16x32xf32>
    %14 = tpu.matmul %11, %13, %cst_15 {dimension_numbers = #tpu.dot_dimension_numbers<[1], [0], [0], [1], [0, 0, 1, 1], [], []>} : vector<16x32xf32>, vector<32x32xf32>, vector<16x32xf32> -> vector<16x32xf32>
    %15 = arith.addf %10, %14 : vector<16x32xf32>
    %c0_16 = arith.constant 0 : index
    %c0_17 = arith.constant 0 : index
    %16 = vector.load %arg12[%c0_16, %c0_17] : memref<16x32xf32, #tpu.memory_space<vmem>>, vector<16x32xf32>
    tpu.vector_store %arg12[%c0_16, %c0_17], %15 {strides = array<i32>} : memref<16x32xf32, #tpu.memory_space<vmem>>, vector<16x32xf32>,
    %c0_18 = arith.constant 0 : index
    %c0_19 = arith.constant 0 : index
    %17 = vector.load %arg13[%c0_18, %c0_19] : memref<16x32xf32, #tpu.memory_space<vmem>>, vector<16x32xf32>
    %c0_20 = arith.constant 0 : index
    %c0_21 = arith.constant 0 : index
    %18 = vector.load %arg5[%c0_20, %c0_21] : memref<16x32xf32, #tpu.memory_space<vmem>>, vector<16x32xf32>
    %c2 = arith.constant 2 : index
    %c0_22 = arith.constant 0 : index
    %c0_23 = arith.constant 0 : index
    %19 = vector.load %arg6[%c2, %c0_22, %c0_23] : memref<3x32x32xf32, #tpu.memory_space<vmem>>, vector<1x32x32xf32>
    %20 = vector.shape_cast %19 : vector<1x32x32xf32> to vector<32x32xf32>
    %cst_24 = arith.constant dense<0.000000e+00> : vector<16x32xf32>
    %21 = tpu.matmul %18, %20, %cst_24 {dimension_numbers = #tpu.dot_dimension_numbers<[1], [0], [0], [1], [0, 0, 1, 1], [], []>} : vector<16x32xf32>, vector<32x32xf32>, vector<16x32xf32> -> vector<16x32xf32>
    %22 = arith.addf %17, %21 : vector<16x32xf32>
    %c0_25 = arith.constant 0 : index
    %c0_26 = arith.constant 0 : index
    %23 = vector.load %arg13[%c0_25, %c0_26] : memref<16x32xf32, #tpu.memory_space<vmem>>, vector<16x32xf32>
    tpu.vector_store %arg13[%c0_25, %c0_26], %22 {strides = array<i32>} : memref<16x32xf32, #tpu.memory_space<vmem>>, vector<16x32xf32>,
    %c0_i32_27 = arith.constant 0 : i32
    %24 = arith.cmpi eq, %arg2, %c0_i32_27 : i32
    %25 = arith.extui %24 : i1 to i32
    %c0_i32_28 = arith.constant 0 : i32
    %26 = arith.cmpi ne, %25, %c0_i32_28 : i32
    scf.if %26 {
      %c0_29 = arith.constant 0 : index
      %c0_30 = arith.constant 0 : index
      %27 = vector.load %arg11[%c0_29, %c0_30] : memref<16x32xf32, #tpu.memory_space<vmem>>, vector<16x32xf32>
      %c0_31 = arith.constant 0 : index
      %c0_32 = arith.constant 0 : index
      %c0_33 = arith.constant 0 : index
      %28 = vector.load %arg7[%c0_31, %c0_32, %c0_33] : memref<3x1x32xf32, #tpu.memory_space<vmem>>, vector<1x1x32xf32>
      %29 = vector.shape_cast %28 : vector<1x1x32xf32> to vector<1x32xf32>
      %30 = vector.broadcast %29 : vector<1x32xf32> to vector<16x32xf32>
      %31 = arith.addf %27, %30 : vector<16x32xf32>
      %c0_34 = arith.constant 0 : index
      %c0_35 = arith.constant 0 : index
      %32 = vector.load %arg8[%c0_34, %c0_35] : memref<16x32xf32, #tpu.memory_space<vmem>>, vector<16x32xf32>
      tpu.vector_store %arg8[%c0_34, %c0_35], %31 {strides = array<i32>} : memref<16x32xf32, #tpu.memory_space<vmem>>, vector<16x32xf32>,
      %c0_36 = arith.constant 0 : index
      %c0_37 = arith.constant 0 : index
      %33 = vector.load %arg12[%c0_36, %c0_37] : memref<16x32xf32, #tpu.memory_space<vmem>>, vector<16x32xf32>
      %c1_38 = arith.constant 1 : index
      %c0_39 = arith.constant 0 : index
      %c0_40 = arith.constant 0 : index
      %34 = vector.load %arg7[%c1_38, %c0_39, %c0_40] : memref<3x1x32xf32, #tpu.memory_space<vmem>>, vector<1x1x32xf32>
      %35 = vector.shape_cast %34 : vector<1x1x32xf32> to vector<1x32xf32>
      %36 = vector.broadcast %35 : vector<1x32xf32> to vector<16x32xf32>
      %37 = arith.addf %33, %36 : vector<16x32xf32>
      %c0_41 = arith.constant 0 : index
      %c0_42 = arith.constant 0 : index
      %38 = vector.load %arg9[%c0_41, %c0_42] : memref<16x32xf32, #tpu.memory_space<vmem>>, vector<16x32xf32>
      tpu.vector_store %arg9[%c0_41, %c0_42], %37 {strides = array<i32>} : memref<16x32xf32, #tpu.memory_space<vmem>>, vector<16x32xf32>,
      %c0_43 = arith.constant 0 : index
      %c0_44 = arith.constant 0 : index
      %39 = vector.load %arg13[%c0_43, %c0_44] : memref<16x32xf32, #tpu.memory_space<vmem>>, vector<16x32xf32>
      %c2_45 = arith.constant 2 : index
      %c0_46 = arith.constant 0 : index
      %c0_47 = arith.constant 0 : index
      %40 = vector.load %arg7[%c2_45, %c0_46, %c0_47] : memref<3x1x32xf32, #tpu.memory_space<vmem>>, vector<1x1x32xf32>
      %41 = vector.shape_cast %40 : vector<1x1x32xf32> to vector<1x32xf32>
      %42 = vector.broadcast %41 : vector<1x32xf32> to vector<16x32xf32>
      %43 = arith.addf %39, %42 : vector<16x32xf32>
      %c0_48 = arith.constant 0 : index
      %c0_49 = arith.constant 0 : index
      %44 = vector.load %arg10[%c0_48, %c0_49] : memref<16x32xf32, #tpu.memory_space<vmem>>, vector<16x32xf32>
      tpu.vector_store %arg10[%c0_48, %c0_49], %43 {strides = array<i32>} : memref<16x32xf32, #tpu.memory_space<vmem>>, vector<16x32xf32>,
    } else {
    }
    return
  }
  func.func @transform_0(%arg0: i32, %arg1: i32, %arg2: i32) -> (i32, i32) {
    %c0_i32 = arith.constant 0 : i32
    return %arg0, %arg2 : i32, i32
  }
  func.func @transform_1(%arg0: i32, %arg1: i32, %arg2: i32) -> (i32, i32) {
    %c0_i32 = arith.constant 0 : i32
    return %arg0, %arg2 : i32, i32
  }
  func.func @transform_2(%arg0: i32, %arg1: i32, %arg2: i32) -> (i32, i32) {
    %c0_i32 = arith.constant 0 : i32
    return %arg0, %arg2 : i32, i32
  }
  func.func @transform_3(%arg0: i32, %arg1: i32, %arg2: i32) -> (i32, i32, i32) {
    %c0_i32 = arith.constant 0 : i32
    %c0_i32_0 = arith.constant 0 : i32
    return %c0_i32, %arg2, %arg1 : i32, i32, i32
  }
  func.func @transform_4(%arg0: i32, %arg1: i32, %arg2: i32) -> (i32, i32, i32) {
    %c0_i32 = arith.constant 0 : i32
    %c0_i32_0 = arith.constant 0 : i32
    %c0_i32_1 = arith.constant 0 : i32
    return %c0_i32, %c0_i32_0, %arg1 : i32, i32, i32
  }
  func.func @transform_5(%arg0: i32, %arg1: i32, %arg2: i32) -> (i32, i32) {
    %c0_i32 = arith.constant 0 : i32
    return %arg0, %arg1 : i32, i32
  }
  func.func @transform_6(%arg0: i32, %arg1: i32, %arg2: i32) -> (i32, i32) {
    %c0_i32 = arith.constant 0 : i32
    return %arg0, %arg1 : i32, i32
  }
  func.func @transform_7(%arg0: i32, %arg1: i32, %arg2: i32) -> (i32, i32) {
    %c0_i32 = arith.constant 0 : i32
    return %arg0, %arg1 : i32, i32
  }
}

</mosaic_0001>

<bundles_post_ra>
// kernel: tpu_custom_call.1
= control target key start
LH: loop header
LB: loop body
LE: loop exit
PB: predicated region body
PF: predicated region fallthrough
CT: control target
= control target key end

     0   :  { %13 = vsyncpa [#allocation6], 0  ;;  %s936_s0 = inlined_call_operand.hbm [shape: f32[16,32], index: 0, kind: input, shape index: {}]   ;;  %s937_s1 = inlined_call_operand.hbm [shape: f32[16,32], index: 1, kind: input, shape index: {}]   ;;  %s938_s2 = inlined_call_operand.hbm [shape: f32[16,32], index: 2, kind: input, shape index: {}]   ;;  %s939_s3 = inlined_call_operand.hbm [shape: f32[3,32,32], index: 3, kind: input, shape index: {}]   ;;  %s940_s4 = inlined_call_operand.vmem [shape: f32[3,1,32], index: 4, kind: input, shape index: {}]   ;;  %s941_s5 = inlined_call_operand.hbm [shape: f32[16,32], index: 5, kind: output, shape index: {0}]   ;;  %s942_s6 = inlined_call_operand.hbm [shape: f32[16,32], index: 6, kind: output, shape index: {1}]   ;;  %s943_s7 = inlined_call_operand.hbm [shape: f32[16,32], index: 7, kind: output, shape index: {2}]  }
   0x1   :  { %14 = vsyncpa [#allocation9], 0 }
   0x2   :  { %15 = vsyncpa [#allocation12], 0 }
   0x3   :  { %16 = vsyncpa [#allocation7], 0 }
   0x4   :  { %17 = vsyncpa [#allocation15], 0  ;;  %s727_s24 = smov [#allocation8]   ;;  %s728_s26 = smov [#allocation5]  }
   0x5   :  { %s35_s25 = sshll.u32 %s727_s24, 4  ;;  %s23_s27 = sshll.u32 %s728_s26, 4  ;;  %s36_s25 = int_to_ptr.vmem [resolvable:$true] %s35_s25  ;;  %s777_s27 = int_to_ptr.vmem [resolvable:$true] %s23_s27 }
   0x6   :  { %s563_s30 = scalar_lea.hbm %s937_s1, 256 }
   0x7   :  { %p564_p0 = scmp.ne.s32.totalorder %s937_s1, %s563_s30  ;;  %p567_p1 = scmp.lt.u32.totalorder %s563_s30, %s937_s1 }
   0x9   :  { %p569_p2 = pnand %p567_p1, %p564_p0 }
   0xb   :  { %572 = shalt.err (!%p569_p2)
}
   0xc   :  { %s573_s12 = scalar_lea.vmem %s36_s25, 256  ;;  %p578_p4 = scmp.lt.s32.totalorder %s36_s25, %s36_s25 }
   0xd   :  { %p574_p3 = scmp.ne.s32.totalorder %s36_s25, %s573_s12  ;;  %p579_p5 = scmp.lt.s32.totalorder %s573_s12, %s573_s12 }
   0xf   :  { %p580_p6 = por %p579_p5, %p578_p4 }
  0x11   :  { %p581_p7 = pnand %p580_p6, %p574_p3 }
  0x13   :  { %584 = shalt.err (!%p581_p7)
}
  0x14   :  { %s729_s13 = smov 128   ;;  %s730_s14 = smov 8  }
  0x15   :  { %41 = dma.hbm_to_vmem [thread:$0]  %s937_s1, 256, %s36_s25, [#allocation9], %s729_s13, %s729_s13, %s730_s14  }
  0x16   :  { %s585_s19 = scalar_lea.hbm %s936_s0, 256 }
  0x17   :  { %p586_p8 = scmp.ne.s32.totalorder %s936_s0, %s585_s19  ;;  %p589_p9 = scmp.lt.u32.totalorder %s585_s19, %s936_s0 }
  0x19   :  { %p591_p10 = pnand %p589_p9, %p586_p8 }
  0x1b   :  { %594 = shalt.err (!%p591_p10)
}
  0x1c   :  { %s595_s24 = scalar_lea.vmem %s777_s27, 256  ;;  %p600_p12 = scmp.lt.s32.totalorder %s777_s27, %s777_s27 }
  0x1d   :  { %p596_p11 = scmp.ne.s32.totalorder %s777_s27, %s595_s24  ;;  %p601_p13 = scmp.lt.s32.totalorder %s595_s24, %s595_s24 }
  0x1f   :  { %p602_p0 = por %p601_p13, %p600_p12 }
  0x21   :  { %p603_p1 = pnand %p602_p0, %p596_p11 }
  0x23   :  { %606 = shalt.err (!%p603_p1)
}
  0x24   :  { %29 = dma.hbm_to_vmem [thread:$0]  %s936_s0, 256, %s777_s27, [#allocation6], %s729_s13, %s729_s13, %s730_s14  }
  0x25   :  { %s731_s26 = smov [#allocation10]   ;;  %s732_s29 = smov [#allocation11]  }
  0x26   :  { %s47_s28 = sshll.u32 %s731_s26, 4  ;;  %s59_s30 = sshll.u32 %s732_s29, 4  ;;  %s48_s28 = int_to_ptr.vmem [resolvable:$true] %s47_s28  ;;  %s814_s30 = int_to_ptr.vmem [resolvable:$true] %s59_s30 }
  0x27   :  { %s607_s10 = scalar_lea.hbm %s938_s2, 256 }
  0x28   :  { %p608_p2 = scmp.ne.s32.totalorder %s938_s2, %s607_s10  ;;  %p611_p3 = scmp.lt.u32.totalorder %s607_s10, %s938_s2 }
  0x2a   :  { %p613_p4 = pnand %p611_p3, %p608_p2 }
  0x2c   :  { %616 = shalt.err (!%p613_p4)
}
  0x2d   :  { %s617_s0 = scalar_lea.vmem %s48_s28, 256  ;;  %p622_p6 = scmp.lt.s32.totalorder %s48_s28, %s48_s28 }
  0x2e   :  { %p618_p5 = scmp.ne.s32.totalorder %s48_s28, %s617_s0  ;;  %p623_p7 = scmp.lt.s32.totalorder %s617_s0, %s617_s0 }
  0x30   :  { %p624_p8 = por %p623_p7, %p622_p6 }
  0x32   :  { %p625_p9 = pnand %p624_p8, %p618_p5 }
  0x34   :  { %628 = shalt.err (!%p625_p9)
}
  0x35   :  { %53 = dma.hbm_to_vmem [thread:$0]  %s938_s2, 256, %s48_s28, [#allocation9], %s729_s13, %s729_s13, %s730_s14  }
  0x36   :  { %s629_s20 = scalar_lea.hbm %s939_s3, 1536 }
  0x37   :  { %p630_p10 = scmp.ne.s32.totalorder %s939_s3, %s629_s20  ;;  %p633_p11 = scmp.lt.u32.totalorder %s629_s20, %s939_s3 }
  0x39   :  { %p635_p12 = pnand %p633_p11, %p630_p10 }
  0x3b   :  { %638 = shalt.err (!%p635_p12)
}
  0x3c   :  { %s639_s1 = scalar_lea.vmem %s814_s30, 1536  ;;  %p644_p0 = scmp.lt.s32.totalorder %s814_s30, %s814_s30 }
  0x3d   :  { %p640_p13 = scmp.ne.s32.totalorder %s814_s30, %s639_s1  ;;  %p645_p1 = scmp.lt.s32.totalorder %s639_s1, %s639_s1 }
  0x3f   :  { %p646_p2 = por %p645_p1, %p644_p0 }
  0x41   :  { %p647_p3 = pnand %p646_p2, %p640_p13 }
  0x43   :  { %650 = shalt.err (!%p647_p3)
}
  0x44   :  { %65 = dma.hbm_to_vmem [thread:$0]  %s939_s3, 1536, %s814_s30, [#allocation12], %s729_s13, %s729_s13, %s730_s14  }
  0x45   :  { %717 = dma.done.wait [#allocation6], 256  }
  0x46   :  { %718 = vsyncadd [#allocation6], 4294967040 }
  0x47   :  { %719 = dma.done.wait [#allocation9], 512  }
  0x48   :  { %720 = vsyncadd [#allocation9], 4294966784 }
  0x49   :  { %721 = dma.done.wait [#allocation12], 1536  }
  0x4a   :  { %722 = vsyncadd [#allocation12], 4294965760  ;;  %vm84_vm0 = vcmask 261120   ;;  %v733_v0 = vmov 0.0   ;;  %v95_v1 = vld [vmem:[#allocation11] sm:$0xff]  ;;  %v96_v2 = vld [vmem:[#allocation11 + $0x8] sm:$0xff] }
  0x4b   :  { %86 = vst.msk [vmem:[#allocation2 + $0x8] sm:$0xff] %vm84_vm0, %v733_v0  ;;  %85 = vst.msk [vmem:[#allocation2] sm:$0xff] %vm84_vm0, %v733_v0  ;;  %v97_v3 = vld [vmem:[#allocation11 + $0x10] sm:$0xff]  ;;  %v529_v4 = vpack.c.bf16 %v96_v2, %v95_v1  ;;  %v98_v5 = vld [vmem:[#allocation11 + $0x18] sm:$0xff]  ;;  %s734_s30 = smov [#allocation13]   ;;  %s735_s9 = smov [#allocation14]  }
  0x4c   :  { %87 = vst.msk [vmem:[#allocation3] sm:$0xff] %vm84_vm0, %v733_v0  ;;  %88 = vst.msk [vmem:[#allocation3 + $0x8] sm:$0xff] %vm84_vm0, %v733_v0  ;;  %v190_v6 = vld [vmem:[#allocation11 + $0x20] sm:$0xff]  ;;  %v191_v7 = vld [vmem:[#allocation11 + $0x28] sm:$0xff]  ;;  %v533_v8 = vpack.c.bf16 %v98_v5, %v97_v3  ;;  %s422_s8 = sshll.u32 %s734_s30, 4  ;;  %s434_s10 = sshll.u32 %s735_s9, 4  ;;  %s423_s8 = int_to_ptr.vmem [resolvable:$true] %s422_s8  ;;  %s875_s10 = int_to_ptr.vmem [resolvable:$true] %s434_s10 }
  0x4d   :  { %89 = vst.msk [vmem:[#allocation4] sm:$0xff] %vm84_vm0, %v733_v0  ;;  %90 = vst.msk [vmem:[#allocation4 + $0x8] sm:$0xff] %vm84_vm0, %v733_v0  ;;  %v537_v9 = vpack.c.bf16 %v191_v7, %v190_v6  ;;  %v93_v10 = vld [vmem:[#allocation5] sm:$0xff]  ;;  %v284_v11 = vld [vmem:[#allocation11 + $0x40] sm:$0xff]  ;;  %530 = vmatprep.subr.bf16.mxu0 %v529_v4  ;;  %s651_s15 = scalar_lea.vmem %s423_s8, 256  ;;  %p656_p5 = scmp.lt.s32.totalorder %s423_s8, %s423_s8 }
  0x4e   :  { %504 = vmatprep.mubr.msk.f32.mxu0 %vm84_vm0, %v93_v10  ;;  %v285_v12 = vld [vmem:[#allocation11 + $0x48] sm:$0xff]  ;;  %v192_v13 = vld [vmem:[#allocation11 + $0x30] sm:$0xff]  ;;  %v193_v14 = vld [vmem:[#allocation11 + $0x38] sm:$0xff]  ;;  %532 = vmatpush3.bf16.msra.mxu0 %v529_v4  ;;  %p652_p4 = scmp.ne.s32.totalorder %s423_s8, %s651_s15  ;;  %p657_p6 = scmp.lt.s32.totalorder %s651_s15, %s651_s15 }
  0x4f   :  { %538 = vmatprep.subr.bf16.mxu1 %v537_v9  ;;  %v541_v15 = vpack.c.bf16 %v193_v14, %v192_v13  ;;  %v187_v16 = vld [vmem:[#allocation8] sm:$0xff]  ;;  %534 = vmatprep.subr.bf16.mxu0 %v533_v8  ;;  %v545_v17 = vpack.c.bf16 %v285_v12, %v284_v11  ;;  %v286_v18 = vld [vmem:[#allocation11 + $0x50] sm:$0xff]  ;;  %v287_v19 = vld [vmem:[#allocation11 + $0x58] sm:$0xff] }
  0x50   :  { %540 = vmatpush3.bf16.msra.mxu1 %v537_v9  ;;  %515 = vmatprep.mubr.msk.f32.mxu1 %vm84_vm0, %v187_v16  ;;  %v94_v20 = vld [vmem:[#allocation5 + $0x8] sm:$0xff]  ;;  %v549_v21 = vpack.c.bf16 %v287_v19, %v286_v18  ;;  %v188_v22 = vld [vmem:[#allocation8 + $0x8] sm:$0xff]  ;;  %v281_v23 = vld [vmem:[#allocation10] sm:$0xff]  ;;  %p658_p7 = por %p657_p6, %p656_p5 }
  0x51   :  { %542 = vmatprep.subr.bf16.mxu1 %v541_v15  ;;  %v282_v24 = vld [vmem:[#allocation10 + $0x8] sm:$0xff]  ;;  %v473_v40 = vld [vmem:[%s940_s4] ss:$0 sm:$0xff]  ;;  %v475_v43 = vld [vmem:[%s940_s4 + $0x1] ss:$0 sm:$0xff] }
  0x52   :  { %536 = vmatpush3.bf16.msra.mxu0 %v533_v8  ;;  %v92_v25 = vld [vmem:[#allocation2 + $0x8] sm:$0xff]  ;;  %v91_v26 = vld [vmem:[#allocation2] sm:$0xff]  ;;  %p659_p8 = pnand %p658_p7, %p652_p4 }
  0x53   :  { %546 = vmatprep.subr.bf16.mxu0 %v545_v17  ;;  %v186_v27 = vld [vmem:[#allocation3 + $0x8] sm:$0xff]  ;;  %v185_v29 = vld [vmem:[#allocation3] sm:$0xff]  ;;  %v477_v53 = vld [vmem:[%s940_s4 + $0x2] ss:$0 sm:$0xff] }
  0x54   :  { %544 = vmatpush3.bf16.msra.mxu1 %v541_v15  ;;  %v280_v37 = vld [vmem:[#allocation4 + $0x8] sm:$0xff]  ;;  %v279_v38 = vld [vmem:[#allocation4] sm:$0xff] }
  0x55   :  { %505 = vmatmul.mubr.msk.f32.vlgmr.msra.gmra.mrb[0].mxu0 %vm84_vm0, %v94_v20 }
  0x56   :  { %548 = vmatpush3.bf16.msra.mxu0 %v545_v17  ;;  %526 = vmatprep.mubr.msk.f32.mxu0 %vm84_vm0, %v281_v23 }
  0x57   :  { %516 = vmatmul.mubr.msk.f32.vlgmr.msra.gmra.mrb[0].mxu1 %vm84_vm0, %v188_v22  ;;  %550 = vmatprep.subr.bf16.mxu0 %v549_v21 }
  0x5a   :  { %552 = vmatpush3.bf16.msra.mxu0 %v549_v21 }
  0x5d   :  { %527 = vmatmul.mubr.msk.f32.vlgmr.msra.gmra.mrb[2].mxu0 %vm84_vm0, %v282_v24 }
 0x128   :  { %v506_v28 = vpop.f32.mrb[0].mxu0 }
 0x129   :  { %v182_v30 = vadd.f32 %v506_v28, %v92_v25  ;;  %v172_v31 = vpop.f32.mrb[1].mxu0 }
 0x12a   :  { %v517_v32 = vpop.f32.mrb[0].mxu1  ;;  %v181_v33 = vadd.f32 %v172_v31, %v91_v26 }
 0x12b   :  { %v276_v34 = vadd.f32 %v517_v32, %v186_v27  ;;  %v266_v35 = vpop.f32.mrb[1].mxu1  ;;  %184 = vst.msk [vmem:[#allocation2 + $0x8] sm:$0xff] %vm84_vm0, %v182_v30 }
 0x12c   :  { %v275_v36 = vadd.f32 %v266_v35, %v185_v29  ;;  %183 = vst.msk [vmem:[#allocation2] sm:$0xff] %vm84_vm0, %v181_v33 }
 0x12d   :  { %278 = vst.msk [vmem:[#allocation3 + $0x8] sm:$0xff] %vm84_vm0, %v276_v34 }
 0x12e   :  { %277 = vst.msk [vmem:[#allocation3] sm:$0xff] %vm84_vm0, %v275_v36 }
 0x130   :  { %v528_v39 = vpop.f32.mrb[2].mxu0 }
 0x131   :  { %v370_v41 = vadd.f32 %v528_v39, %v280_v37  ;;  %v360_v42 = vpop.f32.mrb[3].mxu0 }
 0x132   :  { %v369_v44 = vadd.f32 %v360_v42, %v279_v38  ;;  %v377_v45 = vld [vmem:[#allocation2 + $0x8] sm:$0xff] }
 0x133   :  { %372 = vst.msk [vmem:[#allocation4 + $0x8] sm:$0xff] %vm84_vm0, %v370_v41  ;;  %v376_v47 = vld [vmem:[#allocation2] sm:$0xff]  ;;  %v386_v48 = vadd.f32 %v473_v40, %v377_v45 }
 0x134   :  { %v390_v46 = vld [vmem:[#allocation3 + $0x8] sm:$0xff]  ;;  %371 = vst.msk [vmem:[#allocation4] sm:$0xff] %vm84_vm0, %v369_v44  ;;  %v385_v51 = vadd.f32 %v473_v40, %v376_v47 }
 0x135   :  { %v389_v49 = vld [vmem:[#allocation3] sm:$0xff]  ;;  %v400_v50 = vadd.f32 %v475_v43, %v390_v46  ;;  %388 = vst.msk [vmem:[#allocation13 + $0x8] sm:$0xff] %vm84_vm0, %v386_v48 }
 0x136   :  { %v399_v52 = vadd.f32 %v475_v43, %v389_v49  ;;  %387 = vst.msk [vmem:[#allocation13] sm:$0xff] %vm84_vm0, %v385_v51 }
 0x137   :  { %402 = vst.msk [vmem:[#allocation14 + $0x8] sm:$0xff] %vm84_vm0, %v400_v50 }
 0x138   :  { %401 = vst.msk [vmem:[#allocation14] sm:$0xff] %vm84_vm0, %v399_v52 }
 0x139   :  { %662 = shalt.err (!%p659_p8)
}
 0x13a   :  { %s663_s27 = scalar_lea.hbm %s941_s5, 256 }
 0x13b   :  { %p664_p9 = scmp.ne.s32.totalorder %s941_s5, %s663_s27  ;;  %p667_p10 = scmp.lt.u32.totalorder %s663_s27, %s941_s5 }
 0x13d   :  { %p669_p11 = pnand %p667_p10, %p664_p9 }
 0x13f   :  { %672 = shalt.err (!%p669_p11)
}
 0x140   :  { %428 = dma.vmem_to_hbm [thread:$0]  %s423_s8, 256, %s941_s5, [#allocation7], %s729_s13, %s729_s13, %s730_s14  }
 0x141   :  { %s673_s22 = scalar_lea.vmem %s875_s10, 256  ;;  %p678_p13 = scmp.lt.s32.totalorder %s875_s10, %s875_s10 }
 0x142   :  { %p674_p12 = scmp.ne.s32.totalorder %s875_s10, %s673_s22  ;;  %p679_p0 = scmp.lt.s32.totalorder %s673_s22, %s673_s22 }
 0x144   :  { %p680_p1 = por %p679_p0, %p678_p13 }
 0x146   :  { %p681_p2 = pnand %p680_p1, %p674_p12 }
 0x148   :  { %684 = shalt.err (!%p681_p2)
}
 0x149   :  { %s685_s1 = scalar_lea.hbm %s942_s6, 256 }
 0x14a   :  { %p686_p3 = scmp.ne.s32.totalorder %s942_s6, %s685_s1  ;;  %p689_p4 = scmp.lt.u32.totalorder %s685_s1, %s942_s6 }
 0x14c   :  { %p691_p5 = pnand %p689_p4, %p686_p3 }
 0x14e   :  { %694 = shalt.err (!%p691_p5)
}
 0x14f   :  { %440 = dma.vmem_to_hbm [thread:$0]  %s875_s10, 256, %s942_s6, [#allocation15], %s729_s13, %s729_s13, %s730_s14   ;;  %v404_v54 = vld [vmem:[#allocation4 + $0x8] sm:$0xff]  ;;  %v403_v55 = vld [vmem:[#allocation4] sm:$0xff] }
 0x150   :  { %s736_s29 = smov [#allocation16]   ;;  %v414_v56 = vadd.f32 %v477_v53, %v404_v54  ;;  %v413_v57 = vadd.f32 %v477_v53, %v403_v55 }
 0x151   :  { %s446_s30 = sshll.u32 %s736_s29, 4  ;;  %s447_s30 = int_to_ptr.vmem [resolvable:$true] %s446_s30 }
 0x152   :  { %416 = vst.msk [vmem:[#allocation16 + $0x8] sm:$0xff] %vm84_vm0, %v414_v56  ;;  %415 = vst.msk [vmem:[#allocation16] sm:$0xff] %vm84_vm0, %v413_v57  ;;  %s695_s8 = scalar_lea.vmem %s447_s30, 256  ;;  %p700_p7 = scmp.lt.s32.totalorder %s447_s30, %s447_s30 }
 0x153   :  { %p696_p6 = scmp.ne.s32.totalorder %s447_s30, %s695_s8  ;;  %p701_p8 = scmp.lt.s32.totalorder %s695_s8, %s695_s8 }
 0x155   :  { %p702_p9 = por %p701_p8, %p700_p7 }
 0x157   :  { %p703_p10 = pnand %p702_p9, %p696_p6 }
 0x159   :  { %706 = shalt.err (!%p703_p10)
}
 0x15a   :  { %s707_s10 = scalar_lea.hbm %s943_s7, 256 }
 0x15b   :  { %p708_p11 = scmp.ne.s32.totalorder %s943_s7, %s707_s10  ;;  %p711_p12 = scmp.lt.u32.totalorder %s707_s10, %s943_s7 }
 0x15d   :  { %p713_p13 = pnand %p711_p12, %p708_p11 }
 0x15f   :  { %716 = shalt.err (!%p713_p13)
}
 0x160   :  { %452 = dma.vmem_to_hbm [thread:$0]  %s447_s30, 256, %s943_s7, [#allocation15], %s729_s13, %s729_s13, %s730_s14  }
 0x161   :  { %723 = dma.done.wait [#allocation7], 256  }
 0x162   :  { %724 = vsyncadd [#allocation7], 4294967040 }
 0x163   :  { %725 = dma.done.wait [#allocation15], 512  }
 0x164   :  { %726 = vsyncadd [#allocation15], 4294966784 }
 0x165   :  { %462 = vsyncpa [#allocation6], 1 }
 0x166   :  { %463 = vsyncpa [#allocation9], 1 }
 0x167   :  { %464 = vsyncpa [#allocation12], 1 }
 0x168   :  { %465 = vsyncpa [#allocation7], 1 }
 0x169   :  { %466 = vsyncpa [#allocation15], 1 }

</bundles_post_ra>
